<compile_context>
chip_gen: v6e
topology: v6e:2x2x1
jax: 0.10.0
libtpu: 0.0.40
codegen_flags: <defaults>
</compile_context>

<pallas_src>
import functools

import numpy as np
import jax
import jax.numpy as jnp
from jax import lax
from jax.experimental import pallas as pl
from jax.experimental.pallas import tpu as pltpu


def _patch_merge_ln_kernel(x_ref, w_ref, p_ref, o_ref, *, eps):
    """One (batch, spatial-tile) step: projection + bias + channel LayerNorm.

    x_ref: (1, K, tm)    bf16  flattened patches (K = Cin*f^3), spatial on lanes
    w_ref: (Cout, K)     bf16  projection weight (resident across the grid)
    p_ref: (Cout, 3)     f32   columns: [conv bias | LN gamma | LN beta]
    o_ref: (1, Cout, tm)       output tile, channel-first, spatial on lanes
    """
    acc = jnp.dot(w_ref[...], x_ref[0],
                  preferred_element_type=jnp.float32)          # (Cout, tm) f32
    acc = acc + p_ref[:, 0:1]                                  # conv bias
    mean = jnp.mean(acc, axis=0, keepdims=True)                # LN over channels
    cent = acc - mean
    var = jnp.mean(cent * cent, axis=0, keepdims=True)         # biased var (torch)
    y = cent * lax.rsqrt(var + eps)
    y = y * p_ref[:, 1:2] + p_ref[:, 2:3]                      # gamma, beta
    o_ref[0] = y.astype(o_ref.dtype)


def patch_merging_3d(x, weight, bias, gamma, beta, downscaling_factor, eps=1e-5):
    """PatchMerging3D.forward.

    x:      (B, Cin, D, H, W)
    weight: (Cout, Cin, f, f, f)   -- torch Conv3d weight layout
    bias, gamma, beta: (Cout,)
    returns (B, Cout, D//f, H//f, W//f)
    """
    f = int(downscaling_factor)
    B, Cin, D, H, W = x.shape
    Cout = weight.shape[0]
    assert D % f == 0 and H % f == 0 and W % f == 0, "spatial dims must divide f"
    Dp, Hp, Wp = D // f, H // f, W // f
    K = Cin * f * f * f
    S = Dp * Hp * Wp

    # --- patch extraction as layout plumbing: K axis ordered (cin,kd,kh,kw)
    # to match the flattened conv weight, flat spatial (dp,hp,wp) last (lanes).
    # bf16 cast halves HBM traffic; allow_input_fusion below lets XLA fuse this
    # convert+transpose into the pallas_call input.
    x8 = x.reshape(B, Cin, Dp, f, Hp, f, Wp, f)
    x2d = x8.transpose(0, 1, 3, 5, 7, 2, 4, 6).reshape(B, K, S)
    x2d = x2d.astype(jnp.bfloat16)

    w2d = weight.reshape(Cout, K).astype(jnp.bfloat16)                 # (Cout, K)
    params = jnp.stack([bias, gamma, beta], axis=-1).astype(jnp.float32)  # (Cout, 3)

    out_dtype = x.dtype
    in_item = 2                                    # bf16
    out_item = jnp.dtype(out_dtype).itemsize

    # --- spatial tile tm: largest candidate whose *full* VMEM footprint
    # (double-buffered x/out tiles + resident weight + f32 LN intermediates)
    # fits the budget, while keeping >= 4 grid steps for megacore/pipelining.
    budget = 20 * 1024 * 1024                      # block buffers, << vmem_limit

    def footprint(t):
        return (2 * K * t * in_item                # x tile, double buffered
                + 2 * Cout * t * out_item          # out tile, double buffered
                + 2 * Cout * K * in_item           # resident weight (2 buffers)
                + 2 * Cout * 3 * 4                 # bias/gamma/beta
                + 4 * Cout * t * 4)                # f32 LayerNorm intermediates

    tm = None
    for cand in (4096, 2048, 1024, 512, 256, 128):
        if cand > S or footprint(cand) > budget:
            continue
        if B * pl.cdiv(S, cand) < 4 and cand > 128:
            continue                               # keep >= 4 steps when possible
        tm = cand
        break
    if tm is None:
        tm = S if S < 128 else 128                 # tiny problems: one lane-block
    grid = (B, pl.cdiv(S, tm))                     # partial last tile is fine

    bytes_accessed = (x2d.size * in_item + w2d.size * in_item
                      + params.size * 4 + B * Cout * S * out_item)

    out = pl.pallas_call(
        functools.partial(_patch_merge_ln_kernel, eps=eps),
        out_shape=jax.ShapeDtypeStruct((B, Cout, S), out_dtype),
        grid=grid,
        in_specs=[
            pl.BlockSpec((1, K, tm), lambda b, s: (b, 0, s)),     # patches
            pl.BlockSpec((Cout, K), lambda b, s: (0, 0)),         # weight (resident)
            pl.BlockSpec((Cout, 3), lambda b, s: (0, 0)),         # bias/gamma/beta
        ],
        out_specs=pl.BlockSpec((1, Cout, tm), lambda b, s: (b, 0, s)),
        compiler_params=pltpu.CompilerParams(
            dimension_semantics=("parallel", "parallel"),
            vmem_limit_bytes=40 * 1024 * 1024,
            allow_input_fusion=[True, False, False]),
        cost_estimate=pl.CostEstimate(
            flops=2 * B * S * K * Cout,
            transcendentals=B * S,
            bytes_accessed=int(bytes_accessed)),
    )(x2d, w2d, params)

    # channel-first 5-D output; this reshape is contiguous (free), no transpose.
    return out.reshape(B, Cout, Dp, Hp, Wp)


def _reference(x, weight, bias, gamma, beta, f, eps=1e-5):
    """Pure-JAX reference (f32): Conv3d(k=s=f) + channel LayerNorm."""
    y = lax.conv_general_dilated(
        x, weight, window_strides=(f, f, f), padding="VALID",
        dimension_numbers=("NCDHW", "OIDHW", "NCDHW"))
    y = y + bias.reshape(1, -1, 1, 1, 1)
    mean = jnp.mean(y, axis=1, keepdims=True)
    var = jnp.mean((y - mean) ** 2, axis=1, keepdims=True)
    y = (y - mean) * lax.rsqrt(var + eps)
    return y * gamma.reshape(1, -1, 1, 1, 1) + beta.reshape(1, -1, 1, 1, 1)


if __name__ == "__main__":
    key = jax.random.PRNGKey(0)
    k1, k2, k3, k4, k5 = jax.random.split(key, 5)

    B, Cin, D, H, W = 2, 4, 16, 16, 16
    Cout, f = 32, 2

    x = jax.random.normal(k1, (B, Cin, D, H, W), dtype=jnp.float32)
    weight = jax.random.normal(k2, (Cout, Cin, f, f, f), dtype=jnp.float32) * 0.1
    bias = jax.random.normal(k3, (Cout,), dtype=jnp.float32) * 0.1
    gamma = 1.0 + 0.5 * jax.random.normal(k4, (Cout,), dtype=jnp.float32)
    beta = 0.1 * jax.random.normal(k5, (Cout,), dtype=jnp.float32)

    fwd = jax.jit(functools.partial(patch_merging_3d, downscaling_factor=f))
    out = jax.block_until_ready(fwd(x, weight, bias, gamma, beta))

    ref = _reference(x, weight, bias, gamma, beta, f)
    # bf16 inputs (f32 accumulation / LN) -> loose-but-meaningful tolerance.
    np.testing.assert_allclose(np.asarray(out), np.asarray(ref), rtol=5e-2, atol=5e-2)

    print("KERNEL_OK")
</pallas_src>

<mosaic_0001>
module attributes {stable_mosaic.version = 11 : i64} {
  func.func @_patch_merge_ln_kernel(%arg0: i32, %arg1: i32, %arg2: memref<1x32x256xbf16, #tpu.memory_space<vmem>>, %arg3: memref<32x32xbf16, #tpu.memory_space<vmem>>, %arg4: memref<32x3xf32, #tpu.memory_space<vmem>>, %arg5: memref<1x32x256xf32, #tpu.memory_space<vmem>>) attributes {dimension_semantics = [#tpu.dimension_semantics<parallel>, #tpu.dimension_semantics<parallel>], iteration_bounds = array<i64: 2, 2>, scalar_prefetch = 0 : i64, scratch_operands = 0 : i64, tpu.core_type = #tpu.core_type<tc>, window_params = [{transform_indices = @transform_0, window_bounds = array<i64: 1, 32, 256>}, {pipeline_mode = #tpu.pipeline_mode<synchronous>, transform_indices = @transform_1, window_bounds = array<i64: 32, 32>}, {pipeline_mode = #tpu.pipeline_mode<synchronous>, transform_indices = @transform_2, window_bounds = array<i64: 32, 3>}, {transform_indices = @transform_3, window_bounds = array<i64: 1, 32, 256>}]} {
    %c0 = arith.constant 0 : index
    %c0_0 = arith.constant 0 : index
    %0 = vector.load %arg3[%c0, %c0_0] : memref<32x32xbf16, #tpu.memory_space<vmem>>, vector<32x32xbf16>
    %c0_1 = arith.constant 0 : index
    %c0_2 = arith.constant 0 : index
    %c0_3 = arith.constant 0 : index
    %1 = vector.load %arg2[%c0_1, %c0_2, %c0_3] : memref<1x32x256xbf16, #tpu.memory_space<vmem>>, vector<1x32x256xbf16>
    %2 = vector.shape_cast %1 : vector<1x32x256xbf16> to vector<32x256xbf16>
    %cst = arith.constant dense<0.000000e+00> : vector<32x256xf32>
    %3 = tpu.matmul %0, %2, %cst {dimension_numbers = #tpu.dot_dimension_numbers<[1], [0], [0], [1], [0, 0, 1, 1], [], []>} : vector<32x32xbf16>, vector<32x256xbf16>, vector<32x256xf32> -> vector<32x256xf32>
    %c0_4 = arith.constant 0 : index
    %c0_5 = arith.constant 0 : index
    %4 = vector.load %arg4[%c0_4, %c0_5] : memref<32x3xf32, #tpu.memory_space<vmem>>, vector<32x1xf32>
    %5 = vector.broadcast %4 : vector<32x1xf32> to vector<32x256xf32>
    %6 = arith.addf %3, %5 : vector<32x256xf32>
    %cst_6 = arith.constant dense<0.000000e+00> : vector<256xf32>
    %7 = vector.multi_reduction <add>, %6, %cst_6 [0] : vector<32x256xf32> to vector<256xf32>
    %8 = vector.shape_cast %7 : vector<256xf32> to vector<1x256xf32>
    %cst_7 = arith.constant 3.200000e+01 : f32
    %9 = vector.broadcast %cst_7 : f32 to vector<1x256xf32>
    %10 = arith.divf %8, %9 : vector<1x256xf32>
    %11 = vector.broadcast %10 : vector<1x256xf32> to vector<32x256xf32>
    %12 = arith.subf %6, %11 : vector<32x256xf32>
    %13 = arith.mulf %12, %12 : vector<32x256xf32>
    %cst_8 = arith.constant dense<0.000000e+00> : vector<256xf32>
    %14 = vector.multi_reduction <add>, %13, %cst_8 [0] : vector<32x256xf32> to vector<256xf32>
    %15 = vector.shape_cast %14 : vector<256xf32> to vector<1x256xf32>
    %cst_9 = arith.constant 3.200000e+01 : f32
    %16 = vector.broadcast %cst_9 : f32 to vector<1x256xf32>
    %17 = arith.divf %15, %16 : vector<1x256xf32>
    %cst_10 = arith.constant 9.99999974E-6 : f32
    %18 = vector.broadcast %cst_10 : f32 to vector<1x256xf32>
    %19 = arith.addf %17, %18 : vector<1x256xf32>
    %20 = math.rsqrt %19 : vector<1x256xf32>
    %21 = vector.broadcast %20 : vector<1x256xf32> to vector<32x256xf32>
    %22 = arith.mulf %12, %21 : vector<32x256xf32>
    %c0_11 = arith.constant 0 : index
    %c1 = arith.constant 1 : index
    %23 = vector.load %arg4[%c0_11, %c1] : memref<32x3xf32, #tpu.memory_space<vmem>>, vector<32x1xf32>
    %24 = vector.broadcast %23 : vector<32x1xf32> to vector<32x256xf32>
    %25 = arith.mulf %22, %24 : vector<32x256xf32>
    %c0_12 = arith.constant 0 : index
    %c2 = arith.constant 2 : index
    %26 = vector.load %arg4[%c0_12, %c2] : memref<32x3xf32, #tpu.memory_space<vmem>>, vector<32x1xf32>
    %27 = vector.broadcast %26 : vector<32x1xf32> to vector<32x256xf32>
    %28 = arith.addf %25, %27 : vector<32x256xf32>
    %c0_13 = arith.constant 0 : index
    %c0_14 = arith.constant 0 : index
    %c0_15 = arith.constant 0 : index
    %29 = vector.load %arg5[%c0_13, %c0_14, %c0_15] : memref<1x32x256xf32, #tpu.memory_space<vmem>>, vector<1x32x256xf32>
    %30 = vector.shape_cast %29 : vector<1x32x256xf32> to vector<32x256xf32>
    %31 = vector.shape_cast %28 : vector<32x256xf32> to vector<1x32x256xf32>
    tpu.vector_store %arg5[%c0_13, %c0_14, %c0_15], %31 {strides = array<i32>} : memref<1x32x256xf32, #tpu.memory_space<vmem>>, vector<1x32x256xf32>,
    return
  }
  func.func @transform_0(%arg0: i32, %arg1: i32) -> (i32, i32, i32) {
    %c0_i32 = arith.constant 0 : i32
    %c0_i32_0 = arith.constant 0 : i32
    return %arg0, %c0_i32, %arg1 : i32, i32, i32
  }
  func.func @transform_1(%arg0: i32, %arg1: i32) -> (i32, i32) {
    %c0_i32 = arith.constant 0 : i32
    %c0_i32_0 = arith.constant 0 : i32
    %c0_i32_1 = arith.constant 0 : i32
    return %c0_i32, %c0_i32_0 : i32, i32
  }
  func.func @transform_2(%arg0: i32, %arg1: i32) -> (i32, i32) {
    %c0_i32 = arith.constant 0 : i32
    %c0_i32_0 = arith.constant 0 : i32
    %c0_i32_1 = arith.constant 0 : i32
    return %c0_i32, %c0_i32_0 : i32, i32
  }
  func.func @transform_3(%arg0: i32, %arg1: i32) -> (i32, i32, i32) {
    %c0_i32 = arith.constant 0 : i32
    %c0_i32_0 = arith.constant 0 : i32
    return %arg0, %c0_i32, %arg1 : i32, i32, i32
  }
}

</mosaic_0001>

<bundles_post_ra>
// kernel: patch_merging_3d.1
= control target key start
LH: loop header
LB: loop body
LE: loop exit
PB: predicated region body
PF: predicated region fallthrough
CT: control target
= control target key end

     0   :  { %s783_s12 = smov 0   ;;  %s785_s13 = smov 0   ;;  %s901_s0 = inlined_call_operand.vmem [shape: bf16[2,32,512], index: 0, kind: input, shape index: {}]   ;;  %s902_s1 = inlined_call_operand.vmem [shape: bf16[32,32], index: 1, kind: input, shape index: {}]   ;;  %s903_s2 = inlined_call_operand.vmem [shape: f32[32,3], index: 2, kind: input, shape index: {}]   ;;  %s904_s3 = inlined_call_operand.vmem [shape: f32[2,32,512], index: 3, kind: output, shape index: {}]  }
   0x1   :  { %s787_s14 = smov 0   ;;  %s789_s15 = smov 0  }
   0x2   :  { %s791_s16 = smov 0   ;;  %s793_s17 = smov 0  }
   0x3   :  { %s795_s18 = smov 0  }
   0x4 LB: > { %s22_s19 = sadd.s32 1, %s750_s16  ;;  %s25_s20 = sadd.s32 1, %s754_s17  ;;  %s758_s18 = sphi %s795_s18, %s13_s18   ;;  %s754_s17 = sphi %s793_s17, %s911_s17   ;;  %s750_s16 = sphi %s791_s16, %s910_s16   ;;  %s746_s15 = sphi %s789_s15, %s909_s15   ;;  %s742_s14 = sphi %s787_s14, %s908_s14   ;;  %s738_s13 = sphi %s785_s13, %s907_s13   ;;  %s734_s12 = sphi %s783_s12, %s906_s12  }
   0x5   : > { %p23_p0 = scmp.ge.s32.totalorder %s22_s19, 2  ;;  %s598_s21 = sadd.s32 4294967295, %s758_s18  }
   0x6   : > { %p41_p1 = scmp.ne.s32.totalorder %s738_s13, %s734_s12  ;;  %p42_p2 = scmp.eq.s32.totalorder %s758_s18, 0 }
   0x7   : > { %s913_s19 = smov (%p23_p0, %s22_s19), 0  ;;  %s915_s20 = smov (!%p23_p0, %s25_s20), %s754_s17 }
   0x8   : > { %p27_p3 = scmp.ge.s32.totalorder %s915_s20, 2  ;;  %p115_p4 = scmp.eq.s32.totalorder %s598_s21, 3 }
   0x9   : > { %s30_s22 = ssub.s32 %s750_s16, %s913_s19  ;;  %p43_p5 = por %p42_p2, %p41_p1 }
   0xa   : > { %s917_s20 = smov (%p27_p3, %s915_s20), 0  ;;  %p831_p6 = por %p115_p4, %p41_p1 }
   0xb   : > { %s29_s24 = ssub.s32 %s754_s17, %s917_s20  ;;  %s34_s26 = sadd.s32 1, %s738_s13 }
   0xc   : > { %s31_s25 = sor.u32 %s30_s22, %s29_s24  ;;  %p601_p8 = scmp.ge.s32.totalorder %s758_s18, 4 }
   0xd   : > { %p32_p7 = scmp.eq.s32.totalorder %s31_s25, 0 }
   0xe   : > { %143 = sbr.rel (%p601_p8) target bundleno = 28 (0x1c), region = 24 }
   0xf   : > { %s839_s27 = scalar_select %p32_p7, %s738_s13, %s34_s26  }
  0x13   : > { %146 = sbr.rel (!%p43_p5) target bundleno = 28 (0x1c), region = 28  ;;  %s148_s28 = sand.u32 (%p43_p5), 1, %s738_s13  }
  0x14   : > { %s603_s29 = sshll.u32 (%p43_p5), %s750_s16, 1  ;;  %s602_s30 = sshll.u32 (%p43_p5), %s148_s28, 5 }
  0x15   : > { %s604_s4 = sshll.u32 (%p43_p5), %s754_s17, 4  ;;  %s150_s10 = scalar_lea.vmem (%p43_p5), [#allocation2], %s602_s30 }
  0x16   : > { %s153_s5 = sadd.s32 (%p43_p5), %s604_s4, %s603_s29 }
  0x17   : > { %s605_s6 = sshll.u32 (%p43_p5), %s153_s5, 2 }
  0x18   : > { %s155_s9 = scalar_lea.vmem %s901_s0, %s605_s6 }
  0x19   : > { %v190_v0 = vld [vmem:[%s155_s9] sm:$0xff]  ;;  %v192_v1 = vld [vmem:[%s155_s9 + $0x10] sm:$0xff] }
  0x1a   : > { %v194_v2 = vld [vmem:[%s155_s9 + $0x20] sm:$0xff]  ;;  %191 = vst [vmem:[%s150_s10] sm:$0xff] %v190_v0  ;;  %193 = vst [vmem:[%s150_s10 + $0x8] sm:$0xff] %v192_v1  ;;  %v196_v3 = vld [vmem:[%s155_s9 + $0x30] sm:$0xff] }
  0x1b   : > { %195 = vst [vmem:[%s150_s10 + $0x10] sm:$0xff] %v194_v2  ;;  %197 = vst [vmem:[%s150_s10 + $0x18] sm:$0xff] %v196_v3 }
  0x1c PF: > { %p606_p9 = scmp.ge.s32.totalorder %s758_s18, 1  ;;  %p202_p10 = scmp.lt.s32.totalorder %s758_s18, 5 }
  0x1e   : > { %p203_p11 = pnand %p606_p9, %p202_p10 }
  0x1f   : > { %s209_s11 = sand.u32 (!%p203_p11), 1, %s734_s12  }
  0x20   : > { %206 = sbr.rel (%p203_p11) target bundleno = 326 (0x146), region = 66  ;;  %s607_s21 = sshll.u32 (!%p203_p11), %s209_s11, 5 }
  0x21   : > { %s211_s25 = scalar_lea.vmem (!%p203_p11), [#allocation2], %s607_s21  ;;  %s608_s10 = sshll.u32 (!%p203_p11), %s209_s11, 6 }
  0x22   : > { %s230_s12 = scalar_lea.vmem (!%p203_p11), [#allocation3], %s608_s10 }
  0x25   : > { %v760_v4 = vmov 0   ;;  %v242_v5 = vld [vmem:[%s903_s2] sm:$0xff]  ;;  %v692_v6 = vld [vmem:[%s211_s25 + $0x14] ss:$8 sps:$4 sm:$0xff]   ;;  %v694_v7 = vld [vmem:[%s211_s25 + $0x10] ss:$8 sps:$4 sm:$0xff]  }
  0x26   : > { %335 = vmatprep.mubr.bf16.mxu0 %v760_v4  ;;  %345 = vmatprep.mubr.bf16.mxu1 %v760_v4  ;;  %v695_v8 = vld [vmem:[%s211_s25 + $0x4] ss:$8 sps:$4 sm:$0xff]   ;;  %v244_v9 = vld [vmem:[%s903_s2 + $0x10] sm:$0xff]  ;;  %v697_v10 = vld [vmem:[%s211_s25] ss:$8 sps:$4 sm:$0xff]   ;;  %vm296_vm0 = vcmask 261120  }
  0x27   : > { %686 = vset.pattern.permute.xlu0 %v760_v4  ;;  %687 = vset.pattern.permute.xlu1 %v760_v4  ;;  %v243_v11 = vld [vmem:[%s903_s2 + $0x8] sm:$0xff]  ;;  %v698_v12 = vld [vmem:[%s902_s1] sm:$0xff]   ;;  %v245_v14 = vld [vmem:[%s903_s2 + $0x18] sm:$0xff]  ;;  %v761_v15 = vmov 1   ;;  %v762_v16 = vmov 2   ;;  %s618_s11 = sshll.u32 (%p831_p6), %s742_s14, 1 }
  0x28   : > { %248 = vperm.xlu0 %686, %v242_v5   ;;  %315 = vmatprep.subr.bf16.mxu0 %v692_v6  ;;  %v699_v13 = vld [vmem:[%s902_s1 + $0x8] sm:$0xff]   ;;  %s619_s21 = sshll.u32 (%p831_p6), %s746_s15, 4 }
  0x29   : > { %623 = vmatprep.subr.bf16.mxu1 %v692_v6  ;;  %316 = vmatpush1.bf16.msra.mxu0 %v694_v7  ;;  %s490_s22 = sadd.s32 (%p831_p6), %s619_s21, %s618_s11 }
  0x2a   : > { %625 = vmatpush1.bf16.msra.mxu1 %v694_v7  ;;  %317 = vmatprep.subr.bf16.mxu0 %v695_v8  ;;  %s620_s24 = sshll.u32 (%p831_p6), %s490_s22, 3 }
  0x2b   : > { %624 = vmatprep.subr.bf16.mxu1 %v695_v8  ;;  %258 = vperm.xlu1 %687, %v244_v9   ;;  %s492_s28 = scalar_lea.vmem (%p831_p6), %s904_s3, %s620_s24 }
  0x2c   : > { %253 = vperm.xlu0 %686, %v243_v11  }
  0x2d   : > { %318 = vmatpush1.bf16.msra.mxu0 %v697_v10 }
  0x2e   : > { %626 = vmatpush1.bf16.msra.mxu1 %v697_v10 }
  0x2f   : > { %263 = vperm.xlu1 %687, %v245_v14  }
  0x30   : > { %688 = vset.pattern.permute.xlu0 %v761_v15  ;;  %615 = vmatmul.mubr.msk.bf16.vlgmr.msra.gmra.mxu0 %vm296_vm0, %v698_v12 }
  0x31   : > { %616 = vmatmul.mubr.msk.bf16.vlgmr.msra.gmra.mxu1 %vm296_vm0, %v699_v13  ;;  %426 = vperm.xlu0 %688, %v242_v5  }
  0x33   : > { %689 = vset.pattern.permute.xlu1 %v761_v15 }
  0x34   : > { %430 = vperm.xlu1 %689, %v243_v11  }
  0x35   : > { %438 = vperm.xlu0 %688, %v245_v14  }
  0x38   : > { %434 = vperm.xlu1 %689, %v244_v9  }
  0x39   : > { %691 = vset.pattern.permute.xlu0 %v762_v16 }
  0x3a   : > { %454 = vperm.xlu0 %691, %v243_v11  }
  0x3c   : > { %690 = vset.pattern.permute.xlu1 %v762_v16 }
  0x3d   : > { %450 = vperm.xlu1 %690, %v242_v5  }
  0x41   : > { %458 = vperm.xlu1 %690, %v244_v9  }
  0x45   : > { %462 = vperm.xlu1 %690, %v245_v14  }
  0xa3   : > { %v249_v17 = vpop.permute.xlu0 %248 }
  0xa6   : > { %v259_v18 = vpop.permute.xlu1 %258 }
  0xa7   : > { %v254_v23 = vpop.permute.xlu0 %253 }
  0xaa   : > { %v264_v28 = vpop.permute.xlu1 %263 }
  0xf0   : > { %v337_v19 = vpop.f32.mrf.mxu0 }
  0xf1   : > { %v347_v20 = vpop.f32.mrf.mxu1  ;;  %v338_v26 = vadd.f32 %v337_v19, %v249_v17 }
  0xf2   : > { %v339_v21 = vpop.f32.mrf.mxu0  ;;  %v348_v30 = vadd.f32 %v347_v20, %v259_v18 }
  0xf3   : > { %v349_v22 = vpop.f32.mrf.mxu1  ;;  %v340_v31 = vadd.f32 %v339_v21, %v249_v17 }
  0xf4   : > { %v341_v24 = vpop.f32.mrf.mxu0  ;;  %v350_v35 = vadd.f32 %v349_v22, %v259_v18 }
  0xf5   : > { %v351_v25 = vpop.f32.mrf.mxu1  ;;  %v342_v27 = vadd.f32 %v341_v24, %v254_v23  ;;  %v431_v24 = vpop.permute.xlu1 %430 }
  0xf6   : > { %v343_v29 = vpop.f32.mrf.mxu0  ;;  %v352_v36 = vadd.f32 %v351_v25, %v264_v28 }
  0xf7   : > { %v356_v32 = vadd.f32 %v342_v27, %v338_v26  ;;  %v344_v33 = vadd.f32 %v343_v29, %v254_v23  ;;  %v353_v34 = vpop.f32.mrf.mxu1 }
  0xf8   : > { %v354_v40 = vadd.f32 %v353_v34, %v264_v28 }
  0xf9   : > { %v357_v37 = vadd.f32 %v356_v32, %v348_v30  ;;  %v365_v38 = vadd.f32 %v344_v33, %v340_v31  ;;  %v435_v32 = vpop.permute.xlu1 %434 }
  0xfb   : > { %v358_v39 = vadd.f32 %v357_v37, %v352_v36  ;;  %v366_v41 = vadd.f32 %v365_v38, %v350_v35 }
  0xfd   : > { %v359_v42 = vrot.slane %v358_v39, 4  ;;  %v367_v43 = vadd.f32 %v366_v41, %v354_v40  ;;  %v451_v34 = vpop.permute.xlu1 %450 }
  0xff   : > { %v360_v44 = vadd.f32 %v359_v42, %v358_v39  ;;  %v368_v45 = vrot.slane %v367_v43, 4 }
 0x101   : > { %v361_v46 = vrot.slane %v360_v44, 2  ;;  %v369_v47 = vadd.f32 %v368_v45, %v367_v43 }
 0x103   : > { %v362_v48 = vadd.f32 %v361_v46, %v360_v44  ;;  %v370_v49 = vrot.slane %v369_v47, 2 }
 0x105   : > { %v363_v50 = vrot.slane %v362_v48, 1  ;;  %v371_v51 = vadd.f32 %v370_v49, %v369_v47 }
 0x107   : > { %v364_v52 = vadd.f32 %v363_v50, %v362_v48  ;;  %v372_v53 = vrot.slane %v371_v51, 1 }
 0x109   : > { %v375_v54 = vmul.f32 0.03125, %v364_v52  ;;  %v373_v55 = vadd.f32 %v372_v53, %v371_v51 }
 0x10b   : > { %v376_v56 = vmul.f32 0.03125, %v373_v55  ;;  %v377_v57 = vsub.f32 %v338_v26, %v375_v54  ;;  %v381_v58 = vsub.f32 %v348_v30, %v375_v54  ;;  %v379_v59 = vsub.f32 %v342_v27, %v375_v54 }
 0x10c   : > { %v383_v60 = vsub.f32 %v352_v36, %v375_v54  ;;  %v459_v36 = vpop.permute.xlu1 %458 }
 0x10d   : > { %v378_v61 = vsub.f32 %v340_v31, %v376_v56  ;;  %v382_v62 = vsub.f32 %v350_v35, %v376_v56  ;;  %v380_v63 = vsub.f32 %v344_v33, %v376_v56  ;;  %v385_v0 = vmul.f32 %v377_v57, %v377_v57  ;;  %v427_v33 = vpop.permute.xlu0 %426 }
 0x10e   : > { %v387_v1 = vmul.f32 %v379_v59, %v379_v59  ;;  %v384_v3 = vsub.f32 %v354_v40, %v376_v56  ;;  %v389_v5 = vmul.f32 %v381_v58, %v381_v58  ;;  %v391_v7 = vmul.f32 %v383_v60, %v383_v60 }
 0x10f   : > { %v386_v2 = vmul.f32 %v378_v61, %v378_v61  ;;  %v388_v4 = vmul.f32 %v380_v63, %v380_v63  ;;  %v390_v8 = vmul.f32 %v382_v62, %v382_v62 }
 0x110   : > { %v393_v6 = vadd.f32 %v387_v1, %v385_v0  ;;  %v392_v11 = vmul.f32 %v384_v3, %v384_v3  ;;  %v463_v55 = vpop.permute.xlu1 %462 }
 0x111   : > { %v402_v10 = vadd.f32 %v388_v4, %v386_v2  ;;  %v439_v35 = vpop.permute.xlu0 %438 }
 0x112   : > { %v394_v9 = vadd.f32 %v393_v6, %v389_v5 }
 0x113   : > { %v403_v13 = vadd.f32 %v402_v10, %v390_v8 }
 0x114   : > { %v395_v12 = vadd.f32 %v394_v9, %v391_v7 }
 0x115   : > { %v404_v15 = vadd.f32 %v403_v13, %v392_v11  ;;  %v455_v43 = vpop.permute.xlu0 %454 }
 0x116   : > { %v396_v14 = vrot.slane %v395_v12, 4 }
 0x117   : > { %v405_v17 = vrot.slane %v404_v15, 4 }
 0x118   : > { %v397_v16 = vadd.f32 %v396_v14, %v395_v12 }
 0x119   : > { %v406_v19 = vadd.f32 %v405_v17, %v404_v15 }
 0x11a   : > { %v398_v18 = vrot.slane %v397_v16, 2 }
 0x11b   : > { %v407_v21 = vrot.slane %v406_v19, 2 }
 0x11c   : > { %v399_v20 = vadd.f32 %v398_v18, %v397_v16 }
 0x11d   : > { %v408_v23 = vadd.f32 %v407_v21, %v406_v19 }
 0x11e   : > { %v400_v22 = vrot.slane %v399_v20, 1 }
 0x11f   : > { %v409_v26 = vrot.slane %v408_v23, 1 }
 0x120   : > { %v401_v25 = vadd.f32 %v400_v22, %v399_v20 }
 0x121   : > { %v410_v27 = vadd.f32 %v409_v26, %v408_v23 }
 0x122   : > { %v411_v28 = vmul.f32 0.03125, %v401_v25 }
 0x123   : > { %v412_v29 = vmul.f32 0.03125, %v410_v27 }
 0x124   : > { %v413_v30 = vadd.f32 1e-05, %v411_v28 }
 0x125   : > { %v414_v31 = vadd.f32 1e-05, %v412_v29 }
 0x126   : > { %700 = vrsqrt.f32 %v413_v30 }
 0x127   : > { %702 = vrsqrt.f32 %v414_v31 }
 0x133   : > { %v701_v37 = vpop.eup %700 }
 0x134   : > { %v419_v38 = vmul.f32 %v701_v37, %v379_v59  ;;  %v421_v39 = vmul.f32 %v701_v37, %v381_v58  ;;  %v417_v40 = vmul.f32 %v701_v37, %v377_v57  ;;  %v423_v41 = vmul.f32 %v701_v37, %v383_v60  ;;  %v703_v42 = vpop.eup %702 }
 0x135   : > { %v420_v44 = vmul.f32 %v703_v42, %v380_v63  ;;  %v422_v46 = vmul.f32 %v703_v42, %v382_v62  ;;  %v418_v48 = vmul.f32 %v703_v42, %v378_v61  ;;  %v424_v50 = vmul.f32 %v703_v42, %v384_v3 }
 0x136   : > { %v443_v45 = vmul.f32 %v431_v24, %v419_v38  ;;  %v445_v47 = vmul.f32 %v435_v32, %v421_v39  ;;  %v441_v49 = vmul.f32 %v427_v33, %v417_v40  ;;  %v447_v51 = vmul.f32 %v439_v35, %v423_v41 }
 0x137   : > { %v444_v52 = vmul.f32 %v431_v24, %v420_v44  ;;  %v446_v53 = vmul.f32 %v435_v32, %v422_v46  ;;  %v442_v0 = vmul.f32 %v427_v33, %v418_v48  ;;  %v448_v58 = vmul.f32 %v439_v35, %v424_v50 }
 0x138   : > { %v469_v54 = vadd.f32 %v459_v36, %v445_v47  ;;  %v467_v56 = vadd.f32 %v455_v43, %v443_v45  ;;  %v465_v59 = vadd.f32 %v451_v34, %v441_v49  ;;  %v471_v57 = vadd.f32 %v463_v55, %v447_v51 }
 0x139   : > { %v470_v60 = vadd.f32 %v459_v36, %v446_v53  ;;  %v468_v63 = vadd.f32 %v455_v43, %v444_v52  ;;  %v466_v62 = vadd.f32 %v451_v34, %v442_v0  ;;  %v472_v61 = vadd.f32 %v463_v55, %v448_v58  ;;  %487 = sbr.rel (!%p831_p6) target bundleno = 326 (0x146), region = 74 }
 0x13a   : > { %477 = vst [vmem:[%s230_s12 + $0x20] sm:$0xff] %v469_v54  ;;  %475 = vst [vmem:[%s230_s12 + $0x10] sm:$0xff] %v467_v56 }
 0x13b   : > { %473 = vst [vmem:[%s230_s12] sm:$0xff] %v465_v59  ;;  %479 = vst [vmem:[%s230_s12 + $0x30] sm:$0xff] %v471_v57 }
 0x13c   : > { %478 = vst [vmem:[%s230_s12 + $0x28] sm:$0xff] %v470_v60  ;;  %476 = vst [vmem:[%s230_s12 + $0x18] sm:$0xff] %v468_v63 }
 0x13d   : > { %474 = vst [vmem:[%s230_s12 + $0x8] sm:$0xff] %v466_v62  ;;  %480 = vst [vmem:[%s230_s12 + $0x38] sm:$0xff] %v472_v61 }
 0x141   : > { %v509_v3 = vld [vmem:[%s230_s12 + $0x10] sm:$0xff]  ;;  %v513_v5 = vld [vmem:[%s230_s12 + $0x20] sm:$0xff] }
 0x142   : > { %v505_v1 = vld [vmem:[%s230_s12] sm:$0xff]  ;;  %v517_v7 = vld [vmem:[%s230_s12 + $0x30] sm:$0xff]  ;;  %510 = vst [vmem:[%s492_s28 + $0x20] sm:$0xff] %v509_v3  ;;  %514 = vst [vmem:[%s492_s28 + $0x40] sm:$0xff] %v513_v5 }
 0x143   : > { %v511_v4 = vld [vmem:[%s230_s12 + $0x18] sm:$0xff]  ;;  %v515_v6 = vld [vmem:[%s230_s12 + $0x28] sm:$0xff]  ;;  %506 = vst [vmem:[%s492_s28] sm:$0xff] %v505_v1  ;;  %518 = vst [vmem:[%s492_s28 + $0x60] sm:$0xff] %v517_v7 }
 0x144   : > { %v507_v2 = vld [vmem:[%s230_s12 + $0x8] sm:$0xff]  ;;  %v519_v8 = vld [vmem:[%s230_s12 + $0x38] sm:$0xff]  ;;  %512 = vst [vmem:[%s492_s28 + $0x28] sm:$0xff] %v511_v4  ;;  %516 = vst [vmem:[%s492_s28 + $0x48] sm:$0xff] %v515_v6 }
 0x145   : > { %508 = vst [vmem:[%s492_s28 + $0x8] sm:$0xff] %v507_v2  ;;  %520 = vst [vmem:[%s492_s28 + $0x68] sm:$0xff] %v519_v8 }
 0x146 PF: > { %s13_s18 = sadd.s32 1, %s758_s18   ;;  %s906_s12 = smov %s738_s13 }
 0x147   : > { %p10_p12 = scmp.ge.s32.totalorder %s13_s18, 6   ;;  %s907_s13 = smov %s839_s27 }
 0x148   : > { %s908_s14 = smov %s750_s16  ;;  %s909_s15 = smov %s754_s17 }
 0x149   : > { %s910_s16 = smov %s913_s19  ;;  %s911_s17 = smov %s917_s20 }
 0x14a   :  { %12 = sbr.rel (!%p10_p12) target bundleno = 4 (0x4), region = 128 }

</bundles_post_ra>
